<compile_context>
chip_gen: v7x
topology: tpu7x:2x2x1
jax: 0.10.0
libtpu: 0.0.40
codegen_flags: <defaults>
</compile_context>

<pallas_src>
import math
import functools

import numpy as np
import jax
import jax.numpy as jnp
from jax import lax
from jax.experimental import pallas as pl
from jax.experimental.pallas import tpu as pltpu


# ----------------------------------------------------------------------------- kernel

def _self_attention_kernel(x_ref, wqkv_ref, bqkv_ref, pe_ref, out_ref, *, hidden_p):
    """One grid step = `nb` batch rows (nb == B on single-TC chips).

    x_ref    : (nb*S, D_in)          bf16, batch rows flattened into sublanes
    wqkv_ref : (D_in, 2*hp + hidden) bf16, stacked [Wq*scale pad | Wk pad | Wv]
    bqkv_ref : (1,   2*hp + hidden)  f32 stacked biases
    pe_ref   : (S, hidden)           f32 positional-encoding table
    out_ref  : (nb, S, hidden)       f32 output block (written directly, no pad)
    """
    nb, S, hidden = out_ref.shape

    # Fused Q/K/V projection for all nb*S rows: one bf16 MXU matmul, f32 accum.
    qkv = jnp.dot(x_ref[...], wqkv_ref[...],
                  preferred_element_type=jnp.float32) + bqkv_ref[...]
    pe = pe_ref[...]                                                  # (S, hidden)

    # Statically-unrolled per-batch-row attention (nb is 1 or 2 here).
    for b in range(nb):
        rows = slice(b * S, (b + 1) * S)                              # sublane-aligned
        q = qkv[rows, :hidden_p]                                      # (S, hp)  f32
        k = qkv[rows, hidden_p:2 * hidden_p]                          # (S, hp)  f32
        v = qkv[rows, 2 * hidden_p:]                                  # (S, hidden) f32

        # Scores: contract trailing axes directly (no explicit k.T transpose).
        s = lax.dot_general(q, k, (((1,), (1,)), ((), ())),
                            preferred_element_type=jnp.float32)       # (S, S)

        # Numerically-stable softmax over keys (all f32); reciprocal on the EUP.
        s = s - jnp.max(s, axis=-1, keepdims=True)
        p = jnp.exp(s)
        attn = p * pl.reciprocal(jnp.sum(p, axis=-1, keepdims=True), approx=True)

        # attn @ V on the MXU in bf16, f32 accumulate; add positional encoding.
        o = jnp.dot(attn.astype(jnp.bfloat16), v.astype(jnp.bfloat16),
                    preferred_element_type=jnp.float32)               # (S, hidden)
        out_ref[b] = o + pe


# ----------------------------------------------------------------------------- wrapper

def prepare_params(wq, bq, wk, bk, wv, bv, pe, hidden_dim):
    """Fold softmax scale into Wq/bq, zero-pad Q/K slots to 128 lanes (exact),
    leave the V slot unpadded so attn@V yields `hidden` lanes directly, and
    stack everything into one bf16 weight + one f32 bias row."""
    d_in, hidden = wq.shape
    hidden_p = -(-hidden // 128) * 128
    scale = 1.0 / math.sqrt(hidden_dim)
    pad_w = lambda w: jnp.pad(w, ((0, 0), (0, hidden_p - hidden)))
    pad_b = lambda b: jnp.pad(b, (0, hidden_p - hidden))
    w_qkv = jnp.concatenate([pad_w(wq * scale), pad_w(wk), wv], axis=1)
    b_qkv = jnp.concatenate([pad_b(bq * scale), pad_b(bk), bv]).reshape(1, -1)
    return {
        "w_qkv": w_qkv.astype(jnp.bfloat16),
        "b_qkv": b_qkv.astype(jnp.float32),
        "pe": pe.astype(jnp.float32),
        "hidden": hidden,
        "hidden_p": hidden_p,
    }


def _default_batch_blocks(batch):
    """Single grid step on single-TC chips (v5e/v6e) to kill per-step overhead;
    a 2-wide 'parallel' axis on dual-TC chips (v7x) so both cores get work."""
    try:
        kind = jax.devices()[0].device_kind.lower()
    except Exception:
        kind = ""
    dual_tc = "v7" in kind
    return 2 if (dual_tc and batch % 2 == 0) else 1


def self_attention_pallas(x, prepared, batch_blocks=None):
    """x: (B, S, D_in) float32.  prepared: output of prepare_params."""
    B, S, D_in = x.shape
    hidden = prepared["hidden"]
    hidden_p = prepared["hidden_p"]
    W = 2 * hidden_p + hidden

    if batch_blocks is None:
        batch_blocks = _default_batch_blocks(B)
    assert B % batch_blocks == 0
    nb = B // batch_blocks                      # batch rows handled per grid step

    # Flatten batch into rows on the wrapper side (metadata-only reshape) and
    # cast activations to bf16 — halves activation HBM/VMEM bytes, native MXU rate.
    x_rows = x.reshape(B * S, D_in).astype(jnp.bfloat16)

    kernel = functools.partial(_self_attention_kernel, hidden_p=hidden_p)

    grid_spec = pltpu.PrefetchScalarGridSpec(
        num_scalar_prefetch=0,
        grid=(batch_blocks,),
        in_specs=[
            pl.BlockSpec((nb * S, D_in), lambda g: (g, 0)),   # x rows
            pl.BlockSpec((D_in, W), lambda g: (0, 0)),        # stacked Wqkv (invariant)
            pl.BlockSpec((1, W), lambda g: (0, 0)),           # stacked biases (invariant)
            pl.BlockSpec((S, hidden), lambda g: (0, 0)),      # pe (invariant)
        ],
        out_specs=pl.BlockSpec((nb, S, hidden), lambda g: (g, 0, 0)),
    )

    return pl.pallas_call(
        kernel,
        out_shape=jax.ShapeDtypeStruct((B, S, hidden), jnp.float32),
        grid_spec=grid_spec,
        compiler_params=pltpu.CompilerParams(
            dimension_semantics=("parallel",)),
    )(x_rows, prepared["w_qkv"], prepared["b_qkv"], prepared["pe"])


# ----------------------------------------------------------------------------- setup

def make_positional_encoding(max_seq_len, d_model):
    """Exact reproduction of PositionalEncoder.__init__."""
    pe = np.zeros((max_seq_len, d_model), dtype=np.float32)
    for pos in range(max_seq_len):
        for i in range(0, d_model, 2):
            pe[pos, i] = math.sin(pos / 10000 ** (2 * i / d_model))
            if i + 1 < d_model:
                pe[pos, i + 1] = math.cos(pos / 10000 ** (2 * (i + 1) / d_model))
    return jnp.asarray(pe)


def reference(x, wq, bq, wk, bk, wv, bv, pe, hidden_dim):
    """Pure-JAX f32 mirror of SelfAttention.forward (PyTorch spec)."""
    q = x @ wq + bq
    k = x @ wk + bk
    v = x @ wv + bv
    scores = jnp.einsum("bqd,bkd->bqk", q, k) / math.sqrt(hidden_dim)
    attn = jax.nn.softmax(scores, axis=-1)
    return jnp.einsum("bqk,bkd->bqd", attn, v) + pe[None]


# ----------------------------------------------------------------------------- main

if __name__ == "__main__":
    B, S = 2, 8
    num_vocab, input_dim, hidden_dim = 1000, 16, 32     # num_vocab unused by forward

    key = jax.random.PRNGKey(0)
    kx, kq, kbq, kk, kbk, kv, kbv = jax.random.split(key, 7)
    stdv = 1.0 / math.sqrt(input_dim)                   # mimics the torch uniform init
    u = lambda k_, shape: jax.random.uniform(k_, shape, jnp.float32, -stdv, stdv)

    x = jax.random.normal(kx, (B, S, input_dim), jnp.float32)
    wq, wk, wv = u(kq, (input_dim, hidden_dim)), u(kk, (input_dim, hidden_dim)), u(kv, (input_dim, hidden_dim))
    bq, bk, bv = u(kbq, (hidden_dim,)), u(kbk, (hidden_dim,)), u(kbv, (hidden_dim,))
    pe = make_positional_encoding(30, hidden_dim)[:S]   # PositionalEncoder(max_seq_len=30)

    prepared = prepare_params(wq, bq, wk, bk, wv, bv, pe, hidden_dim)

    out = self_attention_pallas(x, prepared)
    out = jax.block_until_ready(out)

    ref = reference(x, wq, bq, wk, bk, wv, bv, pe, hidden_dim)
    assert out.shape == (B, S, hidden_dim)
    # Tolerance reflects bf16 matmul operands + the EUP approx reciprocal;
    # softmax math itself is f32 and the f32 reference is the gold output.
    np.testing.assert_allclose(np.asarray(out), np.asarray(ref), atol=3e-2, rtol=3e-2)

    print("KERNEL_OK")
</pallas_src>

<mosaic_0001>
module attributes {stable_mosaic.version = 11 : i64} {
  func.func @_self_attention_kernel(%arg0: i32, %arg1: memref<16x16xbf16, #tpu.memory_space<vmem>>, %arg2: memref<16x288xbf16, #tpu.memory_space<vmem>>, %arg3: memref<1x288xf32, #tpu.memory_space<vmem>>, %arg4: memref<8x32xf32, #tpu.memory_space<vmem>>, %arg5: memref<2x8x32xf32, #tpu.memory_space<vmem>>) attributes {dimension_semantics = [#tpu.dimension_semantics<parallel>], iteration_bounds = array<i64: 1>, scalar_prefetch = 0 : i64, scratch_operands = 0 : i64, tpu.core_type = #tpu.core_type<tc>, window_params = [{transform_indices = @transform_0, window_bounds = array<i64: 16, 16>}, {pipeline_mode = #tpu.pipeline_mode<synchronous>, transform_indices = @transform_1, window_bounds = array<i64: 16, 288>}, {pipeline_mode = #tpu.pipeline_mode<synchronous>, transform_indices = @transform_2, window_bounds = array<i64: 1, 288>}, {pipeline_mode = #tpu.pipeline_mode<synchronous>, transform_indices = @transform_3, window_bounds = array<i64: 8, 32>}, {transform_indices = @transform_4, window_bounds = array<i64: 2, 8, 32>}]} {
    %c0 = arith.constant 0 : index
    %c0_0 = arith.constant 0 : index
    %0 = vector.load %arg1[%c0, %c0_0] : memref<16x16xbf16, #tpu.memory_space<vmem>>, vector<16x16xbf16>
    %c0_1 = arith.constant 0 : index
    %c0_2 = arith.constant 0 : index
    %1 = vector.load %arg2[%c0_1, %c0_2] : memref<16x288xbf16, #tpu.memory_space<vmem>>, vector<16x288xbf16>
    %cst = arith.constant dense<0.000000e+00> : vector<16x288xf32>
    %2 = tpu.matmul %0, %1, %cst {dimension_numbers = #tpu.dot_dimension_numbers<[1], [0], [0], [1], [0, 0, 1, 1], [], []>} : vector<16x16xbf16>, vector<16x288xbf16>, vector<16x288xf32> -> vector<16x288xf32>
    %c0_3 = arith.constant 0 : index
    %c0_4 = arith.constant 0 : index
    %3 = vector.load %arg3[%c0_3, %c0_4] : memref<1x288xf32, #tpu.memory_space<vmem>>, vector<1x288xf32>
    %4 = vector.broadcast %3 : vector<1x288xf32> to vector<16x288xf32>
    %5 = arith.addf %2, %4 : vector<16x288xf32>
    %c0_5 = arith.constant 0 : index
    %c0_6 = arith.constant 0 : index
    %6 = vector.load %arg4[%c0_5, %c0_6] : memref<8x32xf32, #tpu.memory_space<vmem>>, vector<8x32xf32>
    %7 = vector.extract_strided_slice %5 {offsets = [0, 0], sizes = [8, 128], strides = [1, 1]} : vector<16x288xf32> to vector<8x128xf32>
    %8 = vector.extract_strided_slice %5 {offsets = [0, 128], sizes = [8, 128], strides = [1, 1]} : vector<16x288xf32> to vector<8x128xf32>
    %9 = vector.extract_strided_slice %5 {offsets = [0, 256], sizes = [8, 32], strides = [1, 1]} : vector<16x288xf32> to vector<8x32xf32>
    %cst_7 = arith.constant dense<0.000000e+00> : vector<8x8xf32>
    %10 = tpu.matmul %7, %8, %cst_7 {dimension_numbers = #tpu.dot_dimension_numbers<[1], [1], [0], [0], [0, 0, 1, 0], [], []>} : vector<8x128xf32>, vector<8x128xf32>, vector<8x8xf32> -> vector<8x8xf32>
    %cst_8 = arith.constant dense<0xFF800000> : vector<8xf32>
    %11 = vector.multi_reduction <maximumf>, %10, %cst_8 [1] : vector<8x8xf32> to vector<8xf32>
    %12 = vector.shape_cast %11 : vector<8xf32> to vector<8x1xf32>
    %13 = vector.broadcast %12 : vector<8x1xf32> to vector<8x8xf32>
    %14 = arith.subf %10, %13 : vector<8x8xf32>
    %15 = math.exp %14 : vector<8x8xf32>
    %cst_9 = arith.constant dense<0.000000e+00> : vector<8xf32>
    %16 = vector.multi_reduction <add>, %15, %cst_9 [1] : vector<8x8xf32> to vector<8xf32>
    %17 = vector.shape_cast %16 : vector<8xf32> to vector<8x1xf32>
    %18 = tpu.reciprocal %17 {approx = true} : vector<8x1xf32> -> vector<8x1xf32>
    %19 = vector.broadcast %18 : vector<8x1xf32> to vector<8x8xf32>
    %20 = arith.mulf %15, %19 : vector<8x8xf32>
    %21 = arith.truncf %20 : vector<8x8xf32> to vector<8x8xbf16>
    %22 = arith.truncf %9 : vector<8x32xf32> to vector<8x32xbf16>
    %cst_10 = arith.constant dense<0.000000e+00> : vector<8x32xf32>
    %23 = tpu.matmul %21, %22, %cst_10 {dimension_numbers = #tpu.dot_dimension_numbers<[1], [0], [0], [1], [0, 0, 1, 1], [], []>} : vector<8x8xbf16>, vector<8x32xbf16>, vector<8x32xf32> -> vector<8x32xf32>
    %24 = arith.addf %23, %6 : vector<8x32xf32>
    %c0_11 = arith.constant 0 : index
    %c0_12 = arith.constant 0 : index
    %c0_13 = arith.constant 0 : index
    %25 = vector.load %arg5[%c0_11, %c0_12, %c0_13] : memref<2x8x32xf32, #tpu.memory_space<vmem>>, vector<1x8x32xf32>
    %26 = vector.shape_cast %25 : vector<1x8x32xf32> to vector<8x32xf32>
    %27 = vector.shape_cast %24 : vector<8x32xf32> to vector<1x8x32xf32>
    tpu.vector_store %arg5[%c0_11, %c0_12, %c0_13], %27 {strides = array<i32>} : memref<2x8x32xf32, #tpu.memory_space<vmem>>, vector<1x8x32xf32>,
    %28 = vector.extract_strided_slice %5 {offsets = [8, 0], sizes = [8, 128], strides = [1, 1]} : vector<16x288xf32> to vector<8x128xf32>
    %29 = vector.extract_strided_slice %5 {offsets = [8, 128], sizes = [8, 128], strides = [1, 1]} : vector<16x288xf32> to vector<8x128xf32>
    %30 = vector.extract_strided_slice %5 {offsets = [8, 256], sizes = [8, 32], strides = [1, 1]} : vector<16x288xf32> to vector<8x32xf32>
    %cst_14 = arith.constant dense<0.000000e+00> : vector<8x8xf32>
    %31 = tpu.matmul %28, %29, %cst_14 {dimension_numbers = #tpu.dot_dimension_numbers<[1], [1], [0], [0], [0, 0, 1, 0], [], []>} : vector<8x128xf32>, vector<8x128xf32>, vector<8x8xf32> -> vector<8x8xf32>
    %cst_15 = arith.constant dense<0xFF800000> : vector<8xf32>
    %32 = vector.multi_reduction <maximumf>, %31, %cst_15 [1] : vector<8x8xf32> to vector<8xf32>
    %33 = vector.shape_cast %32 : vector<8xf32> to vector<8x1xf32>
    %34 = vector.broadcast %33 : vector<8x1xf32> to vector<8x8xf32>
    %35 = arith.subf %31, %34 : vector<8x8xf32>
    %36 = math.exp %35 : vector<8x8xf32>
    %cst_16 = arith.constant dense<0.000000e+00> : vector<8xf32>
    %37 = vector.multi_reduction <add>, %36, %cst_16 [1] : vector<8x8xf32> to vector<8xf32>
    %38 = vector.shape_cast %37 : vector<8xf32> to vector<8x1xf32>
    %39 = tpu.reciprocal %38 {approx = true} : vector<8x1xf32> -> vector<8x1xf32>
    %40 = vector.broadcast %39 : vector<8x1xf32> to vector<8x8xf32>
    %41 = arith.mulf %36, %40 : vector<8x8xf32>
    %42 = arith.truncf %41 : vector<8x8xf32> to vector<8x8xbf16>
    %43 = arith.truncf %30 : vector<8x32xf32> to vector<8x32xbf16>
    %cst_17 = arith.constant dense<0.000000e+00> : vector<8x32xf32>
    %44 = tpu.matmul %42, %43, %cst_17 {dimension_numbers = #tpu.dot_dimension_numbers<[1], [0], [0], [1], [0, 0, 1, 1], [], []>} : vector<8x8xbf16>, vector<8x32xbf16>, vector<8x32xf32> -> vector<8x32xf32>
    %45 = arith.addf %44, %6 : vector<8x32xf32>
    %c1 = arith.constant 1 : index
    %c0_18 = arith.constant 0 : index
    %c0_19 = arith.constant 0 : index
    %46 = vector.load %arg5[%c1, %c0_18, %c0_19] : memref<2x8x32xf32, #tpu.memory_space<vmem>>, vector<1x8x32xf32>
    %47 = vector.shape_cast %46 : vector<1x8x32xf32> to vector<8x32xf32>
    %48 = vector.shape_cast %45 : vector<8x32xf32> to vector<1x8x32xf32>
    tpu.vector_store %arg5[%c1, %c0_18, %c0_19], %48 {strides = array<i32>} : memref<2x8x32xf32, #tpu.memory_space<vmem>>, vector<1x8x32xf32>,
    return
  }
  func.func @transform_0(%arg0: i32) -> (i32, i32) {
    %c0_i32 = arith.constant 0 : i32
    %c0_i32_0 = arith.constant 0 : i32
    return %arg0, %c0_i32 : i32, i32
  }
  func.func @transform_1(%arg0: i32) -> (i32, i32) {
    %c0_i32 = arith.constant 0 : i32
    %c0_i32_0 = arith.constant 0 : i32
    %c0_i32_1 = arith.constant 0 : i32
    return %c0_i32, %c0_i32_0 : i32, i32
  }
  func.func @transform_2(%arg0: i32) -> (i32, i32) {
    %c0_i32 = arith.constant 0 : i32
    %c0_i32_0 = arith.constant 0 : i32
    %c0_i32_1 = arith.constant 0 : i32
    return %c0_i32, %c0_i32_0 : i32, i32
  }
  func.func @transform_3(%arg0: i32) -> (i32, i32) {
    %c0_i32 = arith.constant 0 : i32
    %c0_i32_0 = arith.constant 0 : i32
    %c0_i32_1 = arith.constant 0 : i32
    return %c0_i32, %c0_i32_0 : i32, i32
  }
  func.func @transform_4(%arg0: i32) -> (i32, i32, i32) {
    %c0_i32 = arith.constant 0 : i32
    %c0_i32_0 = arith.constant 0 : i32
    %c0_i32_1 = arith.constant 0 : i32
    return %arg0, %c0_i32, %c0_i32_0 : i32, i32, i32
  }
}

</mosaic_0001>

<bundles_post_ra>
// kernel: tpu_custom_call.1
= control target key start
LH: loop header
LB: loop body
LE: loop exit
PB: predicated region body
PF: predicated region fallthrough
CT: control target
= control target key end

     0   :  { %9 = vsyncpa [#allocation3], 0  ;;  %s697_s0 = inlined_call_operand.hbm [shape: bf16[16,16], index: 0, kind: input, shape index: {}]   ;;  %s698_s1 = inlined_call_operand.hbm [shape: bf16[16,288], index: 1, kind: input, shape index: {}]   ;;  %s699_s2 = inlined_call_operand.vmem [shape: f32[1,288], index: 2, kind: input, shape index: {}]   ;;  %s700_s3 = inlined_call_operand.vmem [shape: f32[8,32], index: 3, kind: input, shape index: {}]   ;;  %s701_s4 = inlined_call_operand.hbm [shape: f32[2,8,32], index: 4, kind: output, shape index: {}]  }
   0x1   :  { %10 = vsyncpa [#allocation6], 0 }
   0x2   :  { %11 = vsyncpa [#allocation4], 0  ;;  %s605_s15 = smov [#allocation2]   ;;  %s533_s19 = scalar_lea.hbm %s697_s0, 128 }
   0x3   :  { %s17_s16 = sshll.u32 %s605_s15, 4  ;;  %p534_p0 = scmp.ne.s32.totalorder %s697_s0, %s533_s19  ;;  %s18_s16 = int_to_ptr.vmem [resolvable:$true] %s17_s16 }
   0x4   :  { %p537_p1 = scmp.lt.u32.totalorder %s533_s19, %s697_s0 }
   0x6   :  { %p539_p2 = pnand %p537_p1, %p534_p0 }
   0x8   :  { %542 = shalt.err (!%p539_p2)
}
   0x9   :  { %s543_s24 = scalar_lea.vmem %s18_s16, 128  ;;  %p548_p4 = scmp.lt.s32.totalorder %s18_s16, %s18_s16 }
   0xa   :  { %p544_p3 = scmp.ne.s32.totalorder %s18_s16, %s543_s24  ;;  %p549_p5 = scmp.lt.s32.totalorder %s543_s24, %s543_s24 }
   0xc   :  { %p550_p6 = por %p549_p5, %p548_p4 }
   0xe   :  { %p551_p7 = pnand %p550_p6, %p544_p3 }
  0x10   :  { %554 = shalt.err (!%p551_p7)
}
  0x11   :  { %s606_s25 = smov 64   ;;  %s607_s26 = smov 4  }
  0x12   :  { %23 = dma.hbm_to_vmem [thread:$0]  %s697_s0, 128, %s18_s16, [#allocation3], %s606_s25, %s606_s25, %s607_s26  }
  0x13   :  { %s608_s29 = smov [#allocation5]   ;;  %s555_s7 = scalar_lea.hbm %s698_s1, 384 }
  0x14   :  { %s29_s30 = sshll.u32 %s608_s29, 4  ;;  %p556_p8 = scmp.ne.s32.totalorder %s698_s1, %s555_s7  ;;  %s30_s30 = int_to_ptr.vmem [resolvable:$true] %s29_s30 }
  0x15   :  { %p559_p9 = scmp.lt.u32.totalorder %s555_s7, %s698_s1 }
  0x17   :  { %p561_p10 = pnand %p559_p9, %p556_p8 }
  0x19   :  { %564 = shalt.err (!%p561_p10)
}
  0x1a   :  { %s565_s12 = scalar_lea.vmem %s30_s30, 384  ;;  %p570_p12 = scmp.lt.s32.totalorder %s30_s30, %s30_s30 }
  0x1b   :  { %p566_p11 = scmp.ne.s32.totalorder %s30_s30, %s565_s12  ;;  %p571_p13 = scmp.lt.s32.totalorder %s565_s12, %s565_s12 }
  0x1d   :  { %p572_p0 = por %p571_p13, %p570_p12 }
  0x1f   :  { %p573_p1 = pnand %p572_p0, %p566_p11 }
  0x21   :  { %576 = shalt.err (!%p573_p1)
}
  0x22   :  { %s609_s0 = smov 192   ;;  %s610_s13 = smov 12  }
  0x23   :  { %35 = dma.hbm_to_vmem [thread:$0]  %s698_s1, 384, %s30_s30, [#allocation6], %s609_s0, %s609_s0, %s610_s13  }
  0x24   :  { %599 = dma.done.wait [#allocation3], 128  }
  0x25   :  { %600 = vsyncadd [#allocation3], 4294967168 }
  0x26   :  { %601 = dma.done.wait [#allocation6], 384  }
  0x27   :  { %602 = vsyncadd [#allocation6], 4294966912  ;;  %v611_v0 = vmov 0   ;;  %v612_v1 = vmov 0.0   ;;  %vm613_vm0 = vmmov 0   ;;  %v523_v4 = vld [vmem:[#allocation2] sm:$0xff]   ;;  %v55_v6 = vlaneseq }
  0x28   :  { %127 = vmatprep.mubr.bf16.mxu0 %v611_v0  ;;  %480 = vmatprep.subr.bf16.mxu1 %v612_v1  ;;  %v520_v2 = vld [vmem:[#allocation5 + $0x4] ss:$12 sps:$4 sm:$0xff]   ;;  %v522_v3 = vld [vmem:[#allocation5] ss:$12 sps:$4 sm:$0xff]   ;;  %vm91_vm1 = vcmask 130048   ;;  %vm267_vm2 = vcmask 1043456  }
  0x29   :  { %482 = vmatprep.mubr.msk.bf16.mxu1 %vm613_vm0, %v612_v1  ;;  %95 = vmatprep.subr.bf16.mxu0 %v520_v2  ;;  %v524_v5 = vld [vmem:[#allocation5 + $0x8] ss:$12 sps:$4 sm:$0xff]   ;;  %v56_v7 = vshrl.u32 %v55_v6, 7  ;;  %v53_v9 = vld [vmem:[%s699_s2] sm:$0x7]  ;;  %vm250_vm3 = vcmask 64512  }
  0x2a   :  { %96 = vmatpush1.bf16.msra.mxu0 %v522_v3  ;;  %481 = vmatpush3.bf16.msra.mxu1 %v524_v5  ;;  %v179_v57 = vld [vmem:[%s700_s3] sm:$0xff]  ;;  %vm311_vm4 = vcmask 261120   ;;  %s614_s18 = smov [#allocation7]  }
  0x2b   :  { %497 = vmatprep.subr.mxu0 %v612_v1  ;;  %486 = vmatprep.subr.mxu1 %v612_v1  ;;  %v61_v8 = vsub.s32 1, %v56_v7  ;;  %v65_v10 = vsub.s32 2, %v56_v7  ;;  %v57_v11 = vsub.s32 0, %v56_v7  ;;  %s449_s19 = sshll.u32 %s614_s18, 4  ;;  %s450_s19 = int_to_ptr.vmem [resolvable:$true] %s449_s19 }
  0x2c   :  { %s577_s20 = scalar_lea.vmem %s450_s19, 256  ;;  %p582_p3 = scmp.lt.s32.totalorder %s450_s19, %s450_s19 }
  0x2d   :  { %466 = vmatmul.mubr.msk.bf16.vlgmr.msra.gmra.mrb[0].mxu0 %vm91_vm1, %v523_v4  ;;  %483 = vmatmul.mubr.msk.bf16.vlgmr.msra.gmra.mrb[0].mxu1 %vm91_vm1, %v523_v4  ;;  %v62_v12 = vrot.slane %v53_v9, %v61_v8  ;;  %v66_v13 = vrot.slane %v53_v9, %v65_v10  ;;  %v58_v15 = vrot.slane %v53_v9, %v57_v11  ;;  %p578_p2 = scmp.ne.s32.totalorder %s450_s19, %s577_s20  ;;  %p583_p4 = scmp.lt.s32.totalorder %s577_s20, %s577_s20 }
  0x2e   :  { %499 = vmatprep.mubr.msk.f32.mxu0 %vm613_vm0, %v612_v1  ;;  %488 = vmatprep.mubr.msk.f32.mxu1 %vm613_vm0, %v612_v1 }
  0x2f   :  { %p584_p5 = por %p583_p4, %p582_p3 }
  0x31   :  { %p585_p6 = pnand %p584_p5, %p578_p2 }
 0x100   :  { %v129_v14 = vpop.f32.mrb[0].mxu0  ;;  %v172_v19 = vpop.f32.mrb[0].mxu1 }
 0x101   :  { %v131_v16 = vpop.f32.mrb[1].mxu0  ;;  %v173_v21 = vadd.f32 %v172_v19, %v66_v13  ;;  %v484_v22 = vpop.f32.mrb[1].mxu1  ;;  %v130_v25 = vadd.f32 %v129_v14, %v58_v15 }
 0x102   :  { %v132_v17 = vadd.f32 %v131_v16, %v62_v12  ;;  %v133_v18 = vpop.f32.mrb[2].mxu0  ;;  %v175_v24 = vpop.f32.mrb[2].mxu1 }
 0x103   :  { %v135_v20 = vpop.f32.mrb[3].mxu0  ;;  %v263_v26 = vpack.c.bf16 %v173_v21, %v173_v21  ;;  %v176_v27 = vadd.f32 %v175_v24, %v66_v13  ;;  %v485_v28 = vpop.f32.mrb[3].mxu1  ;;  %v134_v29 = vadd.f32 %v133_v18, %v58_v15 }
 0x104   :  { %v136_v23 = vadd.f32 %v135_v20, %v62_v12  ;;  %487 = vmatpush3.xpose.msra.mxu1 %v132_v17 }
 0x105   :  { %491 = vmatprep.subr.bf16.mxu1 %v612_v1  ;;  %v269_v30 = vsel %vm267_vm2, %v263_v26, 0  ;;  %v395_v31 = vpack.c.bf16 %v176_v27, %v176_v27 }
 0x106   :  { %498 = vmatpush3.xpose.msra.mxu0 %v136_v23 }
 0x107   :  { %489 = vmatmul.mubr.f32.vlgmr.msra.gmra.mrb[4].mxu1 %v130_v25  ;;  %502 = vmatprep.subr.bf16.mxu0 %v612_v1  ;;  %v400_v32 = vsel %vm267_vm2, %v395_v31, 0 }
 0x108   :  { %492 = vmatpush3.bf16.msra.mxu1 %v269_v30  ;;  %493 = vmatprep.mubr.msk.bf16.mxu1 %vm613_vm0, %v612_v1 }
 0x109   :  { %500 = vmatmul.mubr.f32.vlgmr.msra.gmra.mrb[4].mxu0 %v134_v29 }
 0x10a   :  { %503 = vmatpush3.bf16.msra.mxu0 %v400_v32  ;;  %504 = vmatprep.mubr.msk.bf16.mxu0 %vm613_vm0, %v612_v1 }
 0x1da   :  { %v246_v33 = vpop.f32.mrb[4].mxu1 }
 0x1db   :  { %v490_v34 = vpop.f32.mrb[5].mxu1  ;;  %v251_v35 = vsel %vm250_vm3, %v246_v33, -inf }
 0x1dc   :  { %v379_v36 = vpop.f32.mrb[4].mxu0  ;;  %252 = vmax.xlane.f32.xlu0 %v251_v35 }
 0x1dd   :  { %v501_v37 = vpop.f32.mrb[5].mxu0  ;;  %v383_v38 = vsel %vm250_vm3, %v379_v36, -inf }
 0x1e0   :  { %384 = vmax.xlane.f32.xlu0 %v383_v38 }
 0x269   :  { %v253_v39 = vpop.xlane.xlu0 %252 }
 0x26a   :  { %v254_v40 = vsub.f32 %v246_v33, %v253_v39 }
 0x26c   :  { %v255_v41 = vmul.f32 1.442695, %v254_v40 }
 0x26d   :  { %v385_v42 = vpop.xlane.xlu0 %384 }
 0x26e   :  { %525 = vpow2.f32 %v255_v41  ;;  %v386_v43 = vsub.f32 %v379_v36, %v385_v42 }
 0x270   :  { %v387_v44 = vmul.f32 1.442695, %v386_v43 }
 0x272   :  { %527 = vpow2.f32 %v387_v44 }
 0x278   :  { %v526_v45 = vpop.eup %525 }
 0x279   :  { %v257_v46 = vsel %vm250_vm3, %v526_v45, 0.0 }
 0x27a   :  { %258 = vadd.xlane.f32.xlu1 %v257_v46 }
 0x27c   :  { %v528_v47 = vpop.eup %527 }
 0x27d   :  { %v389_v48 = vsel %vm250_vm3, %v528_v47, 0.0 }
 0x27e   :  { %390 = vadd.xlane.f32.xlu1 %v389_v48 }
 0x307   :  { %v259_v49 = vpop.xlane.xlu1 %258 }
 0x308   :  { %529 = vrcp.f32 %v259_v49 }
 0x30b   :  { %v391_v50 = vpop.xlane.xlu1 %390 }
 0x30c   :  { %531 = vrcp.f32 %v391_v50 }
 0x312   :  { %v530_v51 = vpop.eup %529 }
 0x313   :  { %v261_v52 = vmul.f32 %v530_v51, %v526_v45 }
 0x315   :  { %v262_v53 = vpack.c.bf16 %v261_v52, %v261_v52 }
 0x316   :  { %v532_v54 = vpop.eup %531 }
 0x317   :  { %v393_v55 = vmul.f32 %v532_v54, %v528_v47  ;;  %494 = vmatmul.mubr.msk.bf16.vlgmr.msra.gmra.mrb[8].mxu1 %vm250_vm3, %v262_v53 }
 0x319   :  { %v394_v56 = vpack.c.bf16 %v393_v55, %v393_v55 }
 0x31b   :  { %505 = vmatmul.mubr.msk.bf16.vlgmr.msra.gmra.mrb[8].mxu0 %vm250_vm3, %v394_v56 }
 0x3ea   :  { %v305_v58 = vpop.f32.mrb[8].mxu1 }
 0x3eb   :  { %v306_v59 = vadd.f32 %v305_v58, %v179_v57  ;;  %v495_v60 = vpop.f32.mrb[9].mxu1 }
 0x3ec   :  { %v308_v61 = vpop.f32.mrb[10].mxu1 }
 0x3ed   :  { %312 = vst.msk [vmem:[#allocation7] sm:$0xff] %vm311_vm4, %v306_v59  ;;  %v496_v62 = vpop.f32.mrb[11].mxu1 }
 0x3ee   :  { %v436_v63 = vpop.f32.mrb[8].mxu0 }
 0x3ef   :  { %v437_v0 = vadd.f32 %v436_v63, %v179_v57  ;;  %v506_v1 = vpop.f32.mrb[9].mxu0 }
 0x3f0   :  { %v439_v2 = vpop.f32.mrb[10].mxu0 }
 0x3f1   :  { %443 = vst.msk [vmem:[#allocation7 + $0x8] sm:$0xff] %vm311_vm4, %v437_v0  ;;  %v507_v3 = vpop.f32.mrb[11].mxu0 }
 0x3f2   :  { %588 = shalt.err (!%p585_p6)
}
 0x3f3   :  { %s589_s22 = scalar_lea.hbm %s701_s4, 256 }
 0x3f4   :  { %p590_p7 = scmp.ne.s32.totalorder %s701_s4, %s589_s22  ;;  %p593_p8 = scmp.lt.u32.totalorder %s589_s22, %s701_s4 }
 0x3f6   :  { %p595_p9 = pnand %p593_p8, %p590_p7 }
 0x3f8   :  { %598 = shalt.err (!%p595_p9)
}
 0x3f9   :  { %s615_s27 = smov 128   ;;  %s616_s28 = smov 8  }
 0x3fa   :  { %455 = dma.vmem_to_hbm [thread:$0]  %s450_s19, 256, %s701_s4, [#allocation4], %s615_s27, %s615_s27, %s616_s28  }
 0x3fb   :  { %603 = dma.done.wait [#allocation4], 256  }
 0x3fc   :  { %604 = vsyncadd [#allocation4], 4294967040 }
 0x3fd   :  { %459 = vsyncpa [#allocation3], 1 }
 0x3fe   :  { %460 = vsyncpa [#allocation6], 1 }
 0x3ff   :  { %461 = vsyncpa [#allocation4], 1 }

</bundles_post_ra>
